<compile_context>
chip_gen: v7x
topology: tpu7x:2x2x1
jax: 0.10.0
libtpu: 0.0.40
codegen_flags: <defaults>
</compile_context>

<pallas_src>
import jax
import jax.numpy as jnp
from jax.experimental import pallas as pl
from jax.experimental.pallas import tpu as pltpu

INPUT_SIZE = 2
IN_PAD = 8        # zero-padded input-feature dim (aligned K for the projection dot)
HIDDEN = 16
FC1 = 8
FC2 = 4
FC3 = 1
SUBLANE = 8       # f32 sublane multiple


def lstm_kernel(x_ref,      # (S*Bp, IN_PAD)    time-major, batch-padded, feature-padded input
                wih_ref,    # (IN_PAD, 4*HIDDEN)  W_ih^T (zero-padded rows)
                bias_ref,   # (1, 4*HIDDEN)       b_ih + b_hh
                whh_ref,    # (HIDDEN, 4*HIDDEN)  W_hh^T (fused gates, order i,f,g,o)
                wh_ref,     # (HIDDEN, FC3)       collapsed head weight  W1@W2@W3
                bh_ref,     # (1, FC3)            collapsed head bias
                o_ref):     # (Bp, FC3)
    B = o_ref.shape[0]
    S = x_ref.shape[0] // B

    # Input projection for ALL timesteps in one MXU pass, bias folded in.
    px = jnp.dot(x_ref[...], wih_ref[...],
                 preferred_element_type=jnp.float32) + bias_ref[...]      # (S*Bp, 4H)

    whh = whh_ref[...]                                                     # loaded once

    h = jnp.zeros((B, HIDDEN), jnp.float32)
    c = jnp.zeros((B, HIDDEN), jnp.float32)

    # Fully unrolled recurrence (S is compile-time static): one fused (B,16)x(16,64)
    # MXU dot + 2 gate transcendentals + tanh(c) per step.
    for t in range(S):
        gates = px[t * B:(t + 1) * B, :] + jnp.dot(
            h, whh, preferred_element_type=jnp.float32)                    # (B, 4H)
        sig = jax.nn.sigmoid(gates)          # one EUP pass over the fused 64-lane vreg
        i_g = sig[:, 0 * HIDDEN:1 * HIDDEN]
        f_g = sig[:, 1 * HIDDEN:2 * HIDDEN]
        o_g = sig[:, 3 * HIDDEN:4 * HIDDEN]
        g_g = jnp.tanh(gates[:, 2 * HIDDEN:3 * HIDDEN])
        c = f_g * c + i_g * g_g
        h = o_g * jnp.tanh(c)

    # Collapsed MLP head on the last-timestep hidden state (dropout = identity in eval).
    o_ref[...] = jax.nn.sigmoid(
        jnp.dot(h, wh_ref[...], preferred_element_type=jnp.float32) + bh_ref[...])


def lstm_forward(x, params):
    """x: (batch, seq, INPUT_SIZE) float32. Returns (batch, 1) float32."""
    B, S, I = x.shape
    assert I == INPUT_SIZE
    (w_ih, w_hh, b_ih, b_hh, w1, b1, w2, b2, w3, b3) = params

    x = x.astype(jnp.float32)
    Bp = ((B + SUBLANE - 1) // SUBLANE) * SUBLANE   # pad batch to sublane multiple

    # Tiny layout plumbing only: (B,S,I) -> (S,Bp,IN_PAD) -> (S*Bp, IN_PAD).
    xs = jnp.transpose(x, (1, 0, 2))
    xs = jnp.pad(xs, ((0, 0), (0, Bp - B), (0, IN_PAD - I)))
    xs = xs.reshape(S * Bp, IN_PAD)

    # Fused-gate weights / bias (PyTorch gate order i, f, g, o preserved).
    wih_t = jnp.pad(w_ih.T, ((0, IN_PAD - I), (0, 0)))          # (IN_PAD, 4H), zero rows
    bias = (b_ih + b_hh).reshape(1, 4 * HIDDEN)
    whh_t = w_hh.T                                              # (H, 4H)

    # Collapse the activation-free FC head at trace time (exact up to fp reassociation).
    hp = jax.lax.Precision.HIGHEST
    w_head = jnp.dot(jnp.dot(w1.T, w2.T, precision=hp), w3.T, precision=hp)          # (H, 1)
    b_head = (jnp.dot(jnp.dot(b1.reshape(1, FC1), w2.T, precision=hp), w3.T, precision=hp)
              + jnp.dot(b2.reshape(1, FC2), w3.T, precision=hp)
              + b3.reshape(1, FC3))                                                   # (1, 1)

    args = (xs, wih_t, bias, whh_t, w_head, b_head)

    vmem = pl.BlockSpec(memory_space=pltpu.MemorySpace.VMEM)
    out = pl.pallas_call(
        lstm_kernel,
        out_shape=jax.ShapeDtypeStruct((Bp, FC3), jnp.float32),
        in_specs=[vmem] * len(args),
        out_specs=vmem,
    )(*args)
    return out[:B]


def init_params(key):
    """Deterministic parameter init with PyTorch-like uniform(-1/sqrt(fan), 1/sqrt(fan))."""
    ks = jax.random.split(key, 10)

    def u(k, shape, fan):
        bound = 1.0 / jnp.sqrt(fan)
        return jax.random.uniform(k, shape, jnp.float32, -bound, bound)

    w_ih = u(ks[0], (4 * HIDDEN, INPUT_SIZE), HIDDEN)
    w_hh = u(ks[1], (4 * HIDDEN, HIDDEN), HIDDEN)
    b_ih = u(ks[2], (4 * HIDDEN,), HIDDEN)
    b_hh = u(ks[3], (4 * HIDDEN,), HIDDEN)
    w1 = u(ks[4], (FC1, HIDDEN), HIDDEN)
    b1 = u(ks[5], (FC1,), HIDDEN)
    w2 = u(ks[6], (FC2, FC1), FC1)
    b2 = u(ks[7], (FC2,), FC1)
    w3 = u(ks[8], (FC3, FC2), FC2)
    b3 = u(ks[9], (FC3,), FC2)
    return (w_ih, w_hh, b_ih, b_hh, w1, b1, w2, b2, w3, b3)


def reference_forward(x, params):
    (w_ih, w_hh, b_ih, b_hh, w1, b1, w2, b2, w3, b3) = params
    B, S, _ = x.shape
    h = jnp.zeros((B, HIDDEN), jnp.float32)
    c = jnp.zeros((B, HIDDEN), jnp.float32)
    for t in range(S):
        gates = x[:, t, :] @ w_ih.T + b_ih + h @ w_hh.T + b_hh
        i_g = jax.nn.sigmoid(gates[:, 0 * HIDDEN:1 * HIDDEN])
        f_g = jax.nn.sigmoid(gates[:, 1 * HIDDEN:2 * HIDDEN])
        g_g = jnp.tanh(gates[:, 2 * HIDDEN:3 * HIDDEN])
        o_g = jax.nn.sigmoid(gates[:, 3 * HIDDEN:4 * HIDDEN])
        c = f_g * c + i_g * g_g
        h = o_g * jnp.tanh(c)
    z = h @ w1.T + b1
    z = z @ w2.T + b2
    z = z @ w3.T + b3
    return jax.nn.sigmoid(z)


if __name__ == "__main__":
    key = jax.random.PRNGKey(0)
    k_x, k_p = jax.random.split(key)

    B, S = 2, 8
    x = jax.random.normal(k_x, (B, S, INPUT_SIZE), jnp.float32)
    params = init_params(k_p)

    out = lstm_forward(x, params)
    out = jax.block_until_ready(out)

    ref = reference_forward(x, params)
    assert out.shape == (B, 1), out.shape
    assert jnp.allclose(out, ref, atol=1e-5, rtol=1e-5), (out, ref)

    print("KERNEL_OK")
</pallas_src>

<mosaic_0001>
module attributes {stable_mosaic.version = 11 : i64} {
  func.func @lstm_kernel(%arg0: memref<64x8xf32, #tpu.memory_space<vmem>>, %arg1: memref<8x64xf32, #tpu.memory_space<vmem>>, %arg2: memref<1x64xf32, #tpu.memory_space<vmem>>, %arg3: memref<16x64xf32, #tpu.memory_space<vmem>>, %arg4: memref<16x1xf32, #tpu.memory_space<vmem>>, %arg5: memref<1x1xf32, #tpu.memory_space<vmem>>, %arg6: memref<8x1xf32, #tpu.memory_space<vmem>>) attributes {dimension_semantics = [], scalar_prefetch = 0 : i64, scratch_operands = 0 : i64, tpu.core_type = #tpu.core_type<tc>} {
    %c0 = arith.constant 0 : index
    %c0_0 = arith.constant 0 : index
    %0 = vector.load %arg0[%c0, %c0_0] : memref<64x8xf32, #tpu.memory_space<vmem>>, vector<64x8xf32>
    %c0_1 = arith.constant 0 : index
    %c0_2 = arith.constant 0 : index
    %1 = vector.load %arg1[%c0_1, %c0_2] : memref<8x64xf32, #tpu.memory_space<vmem>>, vector<8x64xf32>
    %cst = arith.constant dense<0.000000e+00> : vector<64x64xf32>
    %2 = tpu.matmul %0, %1, %cst {dimension_numbers = #tpu.dot_dimension_numbers<[1], [0], [0], [1], [0, 0, 1, 1], [], []>} : vector<64x8xf32>, vector<8x64xf32>, vector<64x64xf32> -> vector<64x64xf32>
    %c0_3 = arith.constant 0 : index
    %c0_4 = arith.constant 0 : index
    %3 = vector.load %arg2[%c0_3, %c0_4] : memref<1x64xf32, #tpu.memory_space<vmem>>, vector<1x64xf32>
    %4 = vector.broadcast %3 : vector<1x64xf32> to vector<64x64xf32>
    %5 = arith.addf %2, %4 : vector<64x64xf32>
    %c0_5 = arith.constant 0 : index
    %c0_6 = arith.constant 0 : index
    %6 = vector.load %arg3[%c0_5, %c0_6] : memref<16x64xf32, #tpu.memory_space<vmem>>, vector<16x64xf32>
    %cst_7 = arith.constant 0.000000e+00 : f32
    %7 = vector.broadcast %cst_7 : f32 to vector<8x16xf32>
    %cst_8 = arith.constant 0.000000e+00 : f32
    %8 = vector.broadcast %cst_8 : f32 to vector<8x16xf32>
    %9 = vector.extract_strided_slice %5 {offsets = [0, 0], sizes = [8, 64], strides = [1, 1]} : vector<64x64xf32> to vector<8x64xf32>
    %cst_9 = arith.constant dense<0.000000e+00> : vector<8x64xf32>
    %10 = tpu.matmul %7, %6, %cst_9 {dimension_numbers = #tpu.dot_dimension_numbers<[1], [0], [0], [1], [0, 0, 1, 1], [], []>} : vector<8x16xf32>, vector<16x64xf32>, vector<8x64xf32> -> vector<8x64xf32>
    %11 = arith.addf %9, %10 : vector<8x64xf32>
    %12 = arith.negf %11 : vector<8x64xf32>
    %13 = math.exp %12 : vector<8x64xf32>
    %cst_10 = arith.constant 1.000000e+00 : f32
    %14 = vector.broadcast %cst_10 : f32 to vector<8x64xf32>
    %15 = arith.addf %14, %13 : vector<8x64xf32>
    %16 = arith.divf %14, %15 : vector<8x64xf32>
    %17 = vector.extract_strided_slice %16 {offsets = [0, 0], sizes = [8, 16], strides = [1, 1]} : vector<8x64xf32> to vector<8x16xf32>
    %18 = vector.extract_strided_slice %16 {offsets = [0, 16], sizes = [8, 16], strides = [1, 1]} : vector<8x64xf32> to vector<8x16xf32>
    %19 = vector.extract_strided_slice %16 {offsets = [0, 48], sizes = [8, 16], strides = [1, 1]} : vector<8x64xf32> to vector<8x16xf32>
    %20 = vector.extract_strided_slice %11 {offsets = [0, 32], sizes = [8, 16], strides = [1, 1]} : vector<8x64xf32> to vector<8x16xf32>
    %21 = math.tanh %20 : vector<8x16xf32>
    %22 = arith.mulf %18, %8 : vector<8x16xf32>
    %23 = arith.mulf %17, %21 : vector<8x16xf32>
    %24 = arith.addf %22, %23 : vector<8x16xf32>
    %25 = math.tanh %24 : vector<8x16xf32>
    %26 = arith.mulf %19, %25 : vector<8x16xf32>
    %27 = vector.extract_strided_slice %5 {offsets = [8, 0], sizes = [8, 64], strides = [1, 1]} : vector<64x64xf32> to vector<8x64xf32>
    %cst_11 = arith.constant dense<0.000000e+00> : vector<8x64xf32>
    %28 = tpu.matmul %26, %6, %cst_11 {dimension_numbers = #tpu.dot_dimension_numbers<[1], [0], [0], [1], [0, 0, 1, 1], [], []>} : vector<8x16xf32>, vector<16x64xf32>, vector<8x64xf32> -> vector<8x64xf32>
    %29 = arith.addf %27, %28 : vector<8x64xf32>
    %30 = arith.negf %29 : vector<8x64xf32>
    %31 = math.exp %30 : vector<8x64xf32>
    %cst_12 = arith.constant 1.000000e+00 : f32
    %32 = vector.broadcast %cst_12 : f32 to vector<8x64xf32>
    %33 = arith.addf %32, %31 : vector<8x64xf32>
    %34 = arith.divf %32, %33 : vector<8x64xf32>
    %35 = vector.extract_strided_slice %34 {offsets = [0, 0], sizes = [8, 16], strides = [1, 1]} : vector<8x64xf32> to vector<8x16xf32>
    %36 = vector.extract_strided_slice %34 {offsets = [0, 16], sizes = [8, 16], strides = [1, 1]} : vector<8x64xf32> to vector<8x16xf32>
    %37 = vector.extract_strided_slice %34 {offsets = [0, 48], sizes = [8, 16], strides = [1, 1]} : vector<8x64xf32> to vector<8x16xf32>
    %38 = vector.extract_strided_slice %29 {offsets = [0, 32], sizes = [8, 16], strides = [1, 1]} : vector<8x64xf32> to vector<8x16xf32>
    %39 = math.tanh %38 : vector<8x16xf32>
    %40 = arith.mulf %36, %24 : vector<8x16xf32>
    %41 = arith.mulf %35, %39 : vector<8x16xf32>
    %42 = arith.addf %40, %41 : vector<8x16xf32>
    %43 = math.tanh %42 : vector<8x16xf32>
    %44 = arith.mulf %37, %43 : vector<8x16xf32>
    %45 = vector.extract_strided_slice %5 {offsets = [16, 0], sizes = [8, 64], strides = [1, 1]} : vector<64x64xf32> to vector<8x64xf32>
    %cst_13 = arith.constant dense<0.000000e+00> : vector<8x64xf32>
    %46 = tpu.matmul %44, %6, %cst_13 {dimension_numbers = #tpu.dot_dimension_numbers<[1], [0], [0], [1], [0, 0, 1, 1], [], []>} : vector<8x16xf32>, vector<16x64xf32>, vector<8x64xf32> -> vector<8x64xf32>
    %47 = arith.addf %45, %46 : vector<8x64xf32>
    %48 = arith.negf %47 : vector<8x64xf32>
    %49 = math.exp %48 : vector<8x64xf32>
    %cst_14 = arith.constant 1.000000e+00 : f32
    %50 = vector.broadcast %cst_14 : f32 to vector<8x64xf32>
    %51 = arith.addf %50, %49 : vector<8x64xf32>
    %52 = arith.divf %50, %51 : vector<8x64xf32>
    %53 = vector.extract_strided_slice %52 {offsets = [0, 0], sizes = [8, 16], strides = [1, 1]} : vector<8x64xf32> to vector<8x16xf32>
    %54 = vector.extract_strided_slice %52 {offsets = [0, 16], sizes = [8, 16], strides = [1, 1]} : vector<8x64xf32> to vector<8x16xf32>
    %55 = vector.extract_strided_slice %52 {offsets = [0, 48], sizes = [8, 16], strides = [1, 1]} : vector<8x64xf32> to vector<8x16xf32>
    %56 = vector.extract_strided_slice %47 {offsets = [0, 32], sizes = [8, 16], strides = [1, 1]} : vector<8x64xf32> to vector<8x16xf32>
    %57 = math.tanh %56 : vector<8x16xf32>
    %58 = arith.mulf %54, %42 : vector<8x16xf32>
    %59 = arith.mulf %53, %57 : vector<8x16xf32>
    %60 = arith.addf %58, %59 : vector<8x16xf32>
    %61 = math.tanh %60 : vector<8x16xf32>
    %62 = arith.mulf %55, %61 : vector<8x16xf32>
    %63 = vector.extract_strided_slice %5 {offsets = [24, 0], sizes = [8, 64], strides = [1, 1]} : vector<64x64xf32> to vector<8x64xf32>
    %cst_15 = arith.constant dense<0.000000e+00> : vector<8x64xf32>
    %64 = tpu.matmul %62, %6, %cst_15 {dimension_numbers = #tpu.dot_dimension_numbers<[1], [0], [0], [1], [0, 0, 1, 1], [], []>} : vector<8x16xf32>, vector<16x64xf32>, vector<8x64xf32> -> vector<8x64xf32>
    %65 = arith.addf %63, %64 : vector<8x64xf32>
    %66 = arith.negf %65 : vector<8x64xf32>
    %67 = math.exp %66 : vector<8x64xf32>
    %cst_16 = arith.constant 1.000000e+00 : f32
    %68 = vector.broadcast %cst_16 : f32 to vector<8x64xf32>
    %69 = arith.addf %68, %67 : vector<8x64xf32>
    %70 = arith.divf %68, %69 : vector<8x64xf32>
    %71 = vector.extract_strided_slice %70 {offsets = [0, 0], sizes = [8, 16], strides = [1, 1]} : vector<8x64xf32> to vector<8x16xf32>
    %72 = vector.extract_strided_slice %70 {offsets = [0, 16], sizes = [8, 16], strides = [1, 1]} : vector<8x64xf32> to vector<8x16xf32>
    %73 = vector.extract_strided_slice %70 {offsets = [0, 48], sizes = [8, 16], strides = [1, 1]} : vector<8x64xf32> to vector<8x16xf32>
    %74 = vector.extract_strided_slice %65 {offsets = [0, 32], sizes = [8, 16], strides = [1, 1]} : vector<8x64xf32> to vector<8x16xf32>
    %75 = math.tanh %74 : vector<8x16xf32>
    %76 = arith.mulf %72, %60 : vector<8x16xf32>
    %77 = arith.mulf %71, %75 : vector<8x16xf32>
    %78 = arith.addf %76, %77 : vector<8x16xf32>
    %79 = math.tanh %78 : vector<8x16xf32>
    %80 = arith.mulf %73, %79 : vector<8x16xf32>
    %81 = vector.extract_strided_slice %5 {offsets = [32, 0], sizes = [8, 64], strides = [1, 1]} : vector<64x64xf32> to vector<8x64xf32>
    %cst_17 = arith.constant dense<0.000000e+00> : vector<8x64xf32>
    %82 = tpu.matmul %80, %6, %cst_17 {dimension_numbers = #tpu.dot_dimension_numbers<[1], [0], [0], [1], [0, 0, 1, 1], [], []>} : vector<8x16xf32>, vector<16x64xf32>, vector<8x64xf32> -> vector<8x64xf32>
    %83 = arith.addf %81, %82 : vector<8x64xf32>
    %84 = arith.negf %83 : vector<8x64xf32>
    %85 = math.exp %84 : vector<8x64xf32>
    %cst_18 = arith.constant 1.000000e+00 : f32
    %86 = vector.broadcast %cst_18 : f32 to vector<8x64xf32>
    %87 = arith.addf %86, %85 : vector<8x64xf32>
    %88 = arith.divf %86, %87 : vector<8x64xf32>
    %89 = vector.extract_strided_slice %88 {offsets = [0, 0], sizes = [8, 16], strides = [1, 1]} : vector<8x64xf32> to vector<8x16xf32>
    %90 = vector.extract_strided_slice %88 {offsets = [0, 16], sizes = [8, 16], strides = [1, 1]} : vector<8x64xf32> to vector<8x16xf32>
    %91 = vector.extract_strided_slice %88 {offsets = [0, 48], sizes = [8, 16], strides = [1, 1]} : vector<8x64xf32> to vector<8x16xf32>
    %92 = vector.extract_strided_slice %83 {offsets = [0, 32], sizes = [8, 16], strides = [1, 1]} : vector<8x64xf32> to vector<8x16xf32>
    %93 = math.tanh %92 : vector<8x16xf32>
    %94 = arith.mulf %90, %78 : vector<8x16xf32>
    %95 = arith.mulf %89, %93 : vector<8x16xf32>
    %96 = arith.addf %94, %95 : vector<8x16xf32>
    %97 = math.tanh %96 : vector<8x16xf32>
    %98 = arith.mulf %91, %97 : vector<8x16xf32>
    %99 = vector.extract_strided_slice %5 {offsets = [40, 0], sizes = [8, 64], strides = [1, 1]} : vector<64x64xf32> to vector<8x64xf32>
    %cst_19 = arith.constant dense<0.000000e+00> : vector<8x64xf32>
    %100 = tpu.matmul %98, %6, %cst_19 {dimension_numbers = #tpu.dot_dimension_numbers<[1], [0], [0], [1], [0, 0, 1, 1], [], []>} : vector<8x16xf32>, vector<16x64xf32>, vector<8x64xf32> -> vector<8x64xf32>
    %101 = arith.addf %99, %100 : vector<8x64xf32>
    %102 = arith.negf %101 : vector<8x64xf32>
    %103 = math.exp %102 : vector<8x64xf32>
    %cst_20 = arith.constant 1.000000e+00 : f32
    %104 = vector.broadcast %cst_20 : f32 to vector<8x64xf32>
    %105 = arith.addf %104, %103 : vector<8x64xf32>
    %106 = arith.divf %104, %105 : vector<8x64xf32>
    %107 = vector.extract_strided_slice %106 {offsets = [0, 0], sizes = [8, 16], strides = [1, 1]} : vector<8x64xf32> to vector<8x16xf32>
    %108 = vector.extract_strided_slice %106 {offsets = [0, 16], sizes = [8, 16], strides = [1, 1]} : vector<8x64xf32> to vector<8x16xf32>
    %109 = vector.extract_strided_slice %106 {offsets = [0, 48], sizes = [8, 16], strides = [1, 1]} : vector<8x64xf32> to vector<8x16xf32>
    %110 = vector.extract_strided_slice %101 {offsets = [0, 32], sizes = [8, 16], strides = [1, 1]} : vector<8x64xf32> to vector<8x16xf32>
    %111 = math.tanh %110 : vector<8x16xf32>
    %112 = arith.mulf %108, %96 : vector<8x16xf32>
    %113 = arith.mulf %107, %111 : vector<8x16xf32>
    %114 = arith.addf %112, %113 : vector<8x16xf32>
    %115 = math.tanh %114 : vector<8x16xf32>
    %116 = arith.mulf %109, %115 : vector<8x16xf32>
    %117 = vector.extract_strided_slice %5 {offsets = [48, 0], sizes = [8, 64], strides = [1, 1]} : vector<64x64xf32> to vector<8x64xf32>
    %cst_21 = arith.constant dense<0.000000e+00> : vector<8x64xf32>
    %118 = tpu.matmul %116, %6, %cst_21 {dimension_numbers = #tpu.dot_dimension_numbers<[1], [0], [0], [1], [0, 0, 1, 1], [], []>} : vector<8x16xf32>, vector<16x64xf32>, vector<8x64xf32> -> vector<8x64xf32>
    %119 = arith.addf %117, %118 : vector<8x64xf32>
    %120 = arith.negf %119 : vector<8x64xf32>
    %121 = math.exp %120 : vector<8x64xf32>
    %cst_22 = arith.constant 1.000000e+00 : f32
    %122 = vector.broadcast %cst_22 : f32 to vector<8x64xf32>
    %123 = arith.addf %122, %121 : vector<8x64xf32>
    %124 = arith.divf %122, %123 : vector<8x64xf32>
    %125 = vector.extract_strided_slice %124 {offsets = [0, 0], sizes = [8, 16], strides = [1, 1]} : vector<8x64xf32> to vector<8x16xf32>
    %126 = vector.extract_strided_slice %124 {offsets = [0, 16], sizes = [8, 16], strides = [1, 1]} : vector<8x64xf32> to vector<8x16xf32>
    %127 = vector.extract_strided_slice %124 {offsets = [0, 48], sizes = [8, 16], strides = [1, 1]} : vector<8x64xf32> to vector<8x16xf32>
    %128 = vector.extract_strided_slice %119 {offsets = [0, 32], sizes = [8, 16], strides = [1, 1]} : vector<8x64xf32> to vector<8x16xf32>
    %129 = math.tanh %128 : vector<8x16xf32>
    %130 = arith.mulf %126, %114 : vector<8x16xf32>
    %131 = arith.mulf %125, %129 : vector<8x16xf32>
    %132 = arith.addf %130, %131 : vector<8x16xf32>
    %133 = math.tanh %132 : vector<8x16xf32>
    %134 = arith.mulf %127, %133 : vector<8x16xf32>
    %135 = vector.extract_strided_slice %5 {offsets = [56, 0], sizes = [8, 64], strides = [1, 1]} : vector<64x64xf32> to vector<8x64xf32>
    %cst_23 = arith.constant dense<0.000000e+00> : vector<8x64xf32>
    %136 = tpu.matmul %134, %6, %cst_23 {dimension_numbers = #tpu.dot_dimension_numbers<[1], [0], [0], [1], [0, 0, 1, 1], [], []>} : vector<8x16xf32>, vector<16x64xf32>, vector<8x64xf32> -> vector<8x64xf32>
    %137 = arith.addf %135, %136 : vector<8x64xf32>
    %138 = arith.negf %137 : vector<8x64xf32>
    %139 = math.exp %138 : vector<8x64xf32>
    %cst_24 = arith.constant 1.000000e+00 : f32
    %140 = vector.broadcast %cst_24 : f32 to vector<8x64xf32>
    %141 = arith.addf %140, %139 : vector<8x64xf32>
    %142 = arith.divf %140, %141 : vector<8x64xf32>
    %143 = vector.extract_strided_slice %142 {offsets = [0, 0], sizes = [8, 16], strides = [1, 1]} : vector<8x64xf32> to vector<8x16xf32>
    %144 = vector.extract_strided_slice %142 {offsets = [0, 16], sizes = [8, 16], strides = [1, 1]} : vector<8x64xf32> to vector<8x16xf32>
    %145 = vector.extract_strided_slice %142 {offsets = [0, 48], sizes = [8, 16], strides = [1, 1]} : vector<8x64xf32> to vector<8x16xf32>
    %146 = vector.extract_strided_slice %137 {offsets = [0, 32], sizes = [8, 16], strides = [1, 1]} : vector<8x64xf32> to vector<8x16xf32>
    %147 = math.tanh %146 : vector<8x16xf32>
    %148 = arith.mulf %144, %132 : vector<8x16xf32>
    %149 = arith.mulf %143, %147 : vector<8x16xf32>
    %150 = arith.addf %148, %149 : vector<8x16xf32>
    %151 = math.tanh %150 : vector<8x16xf32>
    %152 = arith.mulf %145, %151 : vector<8x16xf32>
    %c0_25 = arith.constant 0 : index
    %c0_26 = arith.constant 0 : index
    %153 = vector.load %arg4[%c0_25, %c0_26] : memref<16x1xf32, #tpu.memory_space<vmem>>, vector<16x1xf32>
    %cst_27 = arith.constant dense<0.000000e+00> : vector<8x1xf32>
    %154 = tpu.matmul %152, %153, %cst_27 {dimension_numbers = #tpu.dot_dimension_numbers<[1], [0], [0], [1], [0, 0, 1, 1], [], []>} : vector<8x16xf32>, vector<16x1xf32>, vector<8x1xf32> -> vector<8x1xf32>
    %c0_28 = arith.constant 0 : index
    %c0_29 = arith.constant 0 : index
    %155 = vector.load %arg5[%c0_28, %c0_29] : memref<1x1xf32, #tpu.memory_space<vmem>>, vector<1x1xf32>
    %156 = vector.broadcast %155 : vector<1x1xf32> to vector<8x1xf32>
    %157 = arith.addf %154, %156 : vector<8x1xf32>
    %158 = arith.negf %157 : vector<8x1xf32>
    %159 = math.exp %158 : vector<8x1xf32>
    %cst_30 = arith.constant 1.000000e+00 : f32
    %160 = vector.broadcast %cst_30 : f32 to vector<8x1xf32>
    %161 = arith.addf %160, %159 : vector<8x1xf32>
    %162 = arith.divf %160, %161 : vector<8x1xf32>
    %c0_31 = arith.constant 0 : index
    %c0_32 = arith.constant 0 : index
    %163 = vector.load %arg6[%c0_31, %c0_32] : memref<8x1xf32, #tpu.memory_space<vmem>>, vector<8x1xf32>
    tpu.vector_store %arg6[%c0_31, %c0_32], %162 {strides = array<i32>} : memref<8x1xf32, #tpu.memory_space<vmem>>, vector<8x1xf32>,
    return
  }
}

</mosaic_0001>

<bundles_post_ra>
// kernel: tpu_custom_call.1
= control target key start
LH: loop header
LB: loop body
LE: loop exit
PB: predicated region body
PF: predicated region fallthrough
CT: control target
= control target key end

     0   :  { %vm41_vm0 = vcmask 64512   ;;  %v1310_v2 = vmov 0.0|0.0   ;;  %vm1311_vm1 = vmmov 0   ;;  %v1312_v4 = vmov 0.0   ;;  %s1313_s7 = smov 96   ;;  %s1315_s8 = smov 32   ;;  %s1502_s1 = inlined_call_operand.vmem [shape: f32[8,64], index: 1, kind: input, shape index: {}]   ;;  %s1503_s0 = inlined_call_operand.vmem [shape: f32[64,8], index: 0, kind: input, shape index: {}]   ;;  %s1504_s3 = inlined_call_operand.vmem [shape: f32[16,64], index: 3, kind: input, shape index: {}]   ;;  %s1505_s2 = inlined_call_operand.vmem [shape: f32[1,64], index: 2, kind: input, shape index: {}]   ;;  %s1506_s4 = inlined_call_operand.vmem [shape: f32[16,1], index: 4, kind: input, shape index: {}]   ;;  %s1507_s5 = inlined_call_operand.<no memory space> [shape: f32[1,1], index: 5, kind: input, shape index: {}]   ;;  %s1508_s6 = inlined_call_operand.vmem [shape: f32[8,1], index: 6, kind: output, shape index: {}]  }
   0x1   :  { %v33_v0 = vld [vmem:[%s1502_s1] sm:$0xff]  ;;  %1208 = vmatprep.subr.bf16.mxu1 %v1310_v2  ;;  %v26_v3 = vld [vmem:[%s1503_s0 + $0x8] sm:$0xff]  ;;  %1149 = vmatprep.mubr.msk.f32.mxu1 %vm1311_vm1, %v1312_v4  ;;  %s1316_s9 = smov 80   ;;  %vm173_vm2 = vcmask 130048   ;;  %v27_v43 = vld [vmem:[%s1503_s0 + $0x10] sm:$0xff]  ;;  %vm1062_vm3 = vcmask 7168  }
   0x2   :  { %v25_v1 = vld [vmem:[%s1503_s0] sm:$0xff]  ;;  %1131 = vmatprep.subr.mxu0 %v33_v0  ;;  %v172_v6 = vld [vmem:[%s1504_s3 + $0x8] sm:$0xff]  ;;  %v28_v44 = vld [vmem:[%s1503_s0 + $0x18] sm:$0xff] }
   0x3   :  { %1133 = vmatprep.mubr.msk.f32.mxu0 %vm41_vm0, %v25_v1  ;;  %v171_v5 = vld [vmem:[%s1504_s3] sm:$0xff]  ;;  %1132 = vmatpush3.msra.mxu0 %v33_v0 }
   0x4   :  { %v1371_v7 = vpack.c.bf16 %v172_v6, %v171_v5  ;;  %1134 = vmatmul.mubr.msk.f32.vlgmr.msra.gmra.mrb[0].mxu0 %vm41_vm0, %v26_v3  ;;  %1220 = vmatprep.subr.bf16.mxu0 %v1310_v2  ;;  %v1387_v8 = vld [vmem:[%s1505_s2] ss:$0 sm:$0xff]  ;;  %s1314_s2 = smov 16  }
   0x5   :  { %1136 = vmatprep.mubr.msk.f32.mxu0 %vm41_vm0, %v27_v43 }
   0x6   :  { %1210 = vmatpush3.bf16.msra.mxu1 %v1371_v7  ;;  %1222 = vmatpush3.bf16.msra.mxu0 %v1371_v7 }
   0x7   :  { %1211 = vmatprep.subr.bf16.mxu1 %v1310_v2  ;;  %1226 = vmatprep.subr.bf16.mxu0 %v1310_v2 }
   0x8   :  { %1137 = vmatmul.mubr.msk.f32.gmra.mrb[2].mxu0 %vm41_vm0, %v28_v44 }
   0x9   :  { %1150 = vmatmul.mubr.f32.vlgmr.msra.gmra.mrb[0].mxu1 %v1312_v4 }
   0xa   :  { %1213 = vmatpush3.bf16.msra.mxu1 %v1371_v7  ;;  %1156 = vmatprep.mubr.msk.f32.mxu1 %vm1311_vm1, %v1312_v4 }
   0xb   :  { %1214 = vmatprep.subr.bf16.mxu1 %v1310_v2 }
  0xd7   :  { %v1135_v9 = vpop.f32.mrb[0].mxu0 }
  0xd8   :  { %v132_v10 = vpop.f32.mrb[1].mxu0  ;;  %v138_v29 = vadd.f32 %v1135_v9, %v1387_v8 }
  0xd9   :  { %v133_v11 = vadd.f32 %v1387_v8, %v132_v10 }
  0xdb   :  { %v1138_v48 = vpop.f32.mrb[2].mxu0 }
  0xdc   :  { %v243_v12 = vpop.f32.mrb[0].mxu1  ;;  %v142_v49 = vpop.f32.mrb[3].mxu0  ;;  %v148_v9 = vadd.f32 %v1138_v48, %v1387_v8 }
  0xdd   :  { %v247_v13 = vadd.f32 %v243_v12, %v133_v11  ;;  %v1151_v14 = vpop.f32.mrb[1].mxu1  ;;  %v143_v51 = vadd.f32 %v1387_v8, %v142_v49 }
  0xdf   :  { %1242 = vtanh.f32 %v247_v13  ;;  %v1077_v16 = vmul.f32 -1.442695, %v247_v13 }
  0xe1   :  { %1244 = vpow2.f32 %v1077_v16 }
  0xe9   :  { %v1243_v15 = vpop.eup %1242 }
  0xea   :  { %257 = vrot.lane.b32.xlu0 %v1243_v15, %s1313_s7 }
  0xeb   :  { %v1245_v17 = vpop.eup %1244 }
  0xec   :  { %v251_v18 = vadd.f32 1.0, %v1245_v17 }
  0xee   :  { %1246 = vrcp.f32 %v251_v18 }
  0xf8   :  { %v1247_v19 = vpop.eup %1246 }
  0xf9   :  { %v255_v22 = vmul.f32 0.0, %v1247_v19 }
 0x15c   :  { %v258_v20 = vpop.permute.xlu0 %257 }
 0x15d   :  { %v260_v21 = vmul.f32 %v1247_v19, %v258_v20 }
 0x15f   :  { %262 = vrot.lane.b32.xlu0 %v260_v21, %s1314_s2 }
 0x1d1   :  { %v263_v23 = vpop.permute.xlu0 %262 }
 0x1d2   :  { %v265_v24 = vadd.f32 %v263_v23, %v255_v22  ;;  %v29_v23 = vld [vmem:[%s1503_s0 + $0x20] sm:$0xff] }
 0x1d3   :  { %1139 = vmatprep.mubr.msk.f32.mxu0 %vm41_vm0, %v29_v23 }
 0x1d4   :  { %1248 = vtanh.f32 %v265_v24 }
 0x1de   :  { %v1249_v25 = vpop.eup %1248 }
 0x1df   :  { %268 = vrot.lane.b32.xlu1 %v1249_v25, %s1315_s8  ;;  %v31_v25 = vld [vmem:[%s1503_s0 + $0x30] sm:$0xff] }
 0x251   :  { %v269_v26 = vpop.permute.xlu1 %268 }
 0x252   :  { %v271_v27 = vmul.f32 %v1247_v19, %v269_v26  ;;  %v32_v26 = vld [vmem:[%s1503_s0 + $0x38] sm:$0xff] }
 0x254   :  { %273 = vrot.lane.b32.xlu1 %v271_v27, %s1316_s9 }
 0x2c6   :  { %v274_v28 = vpop.permute.xlu1 %273 }
 0x2c7   :  { %1157 = vmatmul.mubr.msk.f32.vlgmr.msra.gmra.mrb[2].mxu1 %vm173_vm2, %v274_v28 }
 0x2c8   :  { %1216 = vmatpush3.bf16.msra.mxu1 %v1371_v7  ;;  %1163 = vmatprep.mubr.msk.f32.mxu1 %vm1311_vm1, %v1312_v4 }
 0x2c9   :  { %1217 = vmatprep.subr.bf16.mxu1 %v1310_v2 }
 0x39a   :  { %v343_v30 = vpop.f32.mrb[2].mxu1 }
 0x39b   :  { %v347_v31 = vadd.f32 %v343_v30, %v138_v29  ;;  %v1158_v32 = vpop.f32.mrb[3].mxu1 }
 0x39d   :  { %1250 = vtanh.f32 %v347_v31  ;;  %v1079_v34 = vmul.f32 -1.442695, %v347_v31 }
 0x39f   :  { %1252 = vpow2.f32 %v1079_v34 }
 0x3a7   :  { %v1251_v33 = vpop.eup %1250 }
 0x3a8   :  { %357 = vrot.lane.b32.xlu0 %v1251_v33, %s1313_s7 }
 0x3a9   :  { %v1253_v35 = vpop.eup %1252 }
 0x3aa   :  { %v351_v36 = vadd.f32 1.0, %v1253_v35 }
 0x3ac   :  { %1254 = vrcp.f32 %v351_v36 }
 0x3b6   :  { %v1255_v37 = vpop.eup %1254 }
 0x3b7   :  { %v355_v40 = vmul.f32 %v1255_v37, %v265_v24  ;;  %v30_v24 = vld [vmem:[%s1503_s0 + $0x28] sm:$0xff] }
 0x3b8   :  { %1140 = vmatmul.mubr.msk.f32.gmra.mrb[4].mxu0 %vm41_vm0, %v30_v24 }
 0x3b9   :  { %1142 = vmatprep.mubr.msk.f32.mxu0 %vm41_vm0, %v31_v25 }
 0x3bc   :  { %1143 = vmatmul.mubr.msk.f32.gmra.mrb[6].mxu0 %vm41_vm0, %v32_v26 }
 0x3bd   :  { %1177 = vmatprep.mubr.msk.f32.mxu0 %vm1311_vm1, %v1312_v4 }
 0x41a   :  { %v358_v38 = vpop.permute.xlu0 %357 }
 0x41b   :  { %v360_v39 = vmul.f32 %v1255_v37, %v358_v38 }
 0x41d   :  { %362 = vrot.lane.b32.xlu1 %v360_v39, %s1314_s2 }
 0x48b   :  { %v1141_v30 = vpop.f32.mrb[4].mxu0 }
 0x48c   :  { %v152_v31 = vpop.f32.mrb[5].mxu0 }
 0x48d   :  { %v153_v35 = vadd.f32 %v1387_v8, %v152_v31 }
 0x48f   :  { %v363_v41 = vpop.permute.xlu1 %362  ;;  %v1450_v32 = vpop.f32.mrb[6].mxu0 }
 0x490   :  { %v365_v42 = vadd.f32 %v363_v41, %v355_v40  ;;  %v1452_v33 = vpop.f32.mrb[7].mxu0  ;;  %v168_v26 = vadd.f32 %v1450_v32, %v1387_v8  ;;  %v972_v32 = vld [vmem:[%s1506_s4] sm:$0xff] }
 0x492   :  { %1256 = vtanh.f32 %v365_v42 }
 0x49c   :  { %v1257_v45 = vpop.eup %1256 }
 0x49d   :  { %368 = vrot.lane.b32.xlu0 %v1257_v45, %s1315_s8 }
 0x50f   :  { %v369_v46 = vpop.permute.xlu0 %368 }
 0x510   :  { %v371_v47 = vmul.f32 %v1255_v37, %v369_v46 }
 0x512   :  { %373 = vrot.lane.b32.xlu1 %v371_v47, %s1316_s9 }
 0x584   :  { %v374_v50 = vpop.permute.xlu1 %373 }
 0x585   :  { %1164 = vmatmul.mubr.msk.f32.vlgmr.msra.gmra.mrb[4].mxu1 %vm173_vm2, %v374_v50 }
 0x586   :  { %1219 = vmatpush3.bf16.msra.mxu1 %v1371_v7  ;;  %1170 = vmatprep.mubr.msk.f32.mxu1 %vm1311_vm1, %v1312_v4 }
 0x587   :  { %1223 = vmatprep.subr.bf16.mxu1 %v1310_v2 }
 0x658   :  { %v443_v52 = vpop.f32.mrb[4].mxu1 }
 0x659   :  { %v447_v53 = vadd.f32 %v443_v52, %v143_v51  ;;  %v1165_v54 = vpop.f32.mrb[5].mxu1  ;;  %v158_v52 = vadd.f32 %v1141_v30, %v1387_v8 }
 0x65b   :  { %1258 = vtanh.f32 %v447_v53  ;;  %v1081_v56 = vmul.f32 -1.442695, %v447_v53 }
 0x65d   :  { %1260 = vpow2.f32 %v1081_v56 }
 0x665   :  { %v1259_v55 = vpop.eup %1258 }
 0x666   :  { %457 = vrot.lane.b32.xlu0 %v1259_v55, %s1313_s7 }
 0x667   :  { %v1261_v57 = vpop.eup %1260 }
 0x668   :  { %v451_v58 = vadd.f32 1.0, %v1261_v57 }
 0x66a   :  { %1262 = vrcp.f32 %v451_v58 }
 0x674   :  { %v1263_v59 = vpop.eup %1262 }
 0x675   :  { %v455_v62 = vmul.f32 %v1263_v59, %v365_v42 }
 0x6d8   :  { %v458_v60 = vpop.permute.xlu0 %457 }
 0x6d9   :  { %v460_v61 = vmul.f32 %v1263_v59, %v458_v60 }
 0x6db   :  { %462 = vrot.lane.b32.xlu1 %v460_v61, %s1314_s2 }
 0x74d   :  { %v463_v63 = vpop.permute.xlu1 %462 }
 0x74e   :  { %v465_v0 = vadd.f32 %v463_v63, %v455_v62 }
 0x750   :  { %1264 = vtanh.f32 %v465_v0 }
 0x75a   :  { %v1265_v1 = vpop.eup %1264 }
 0x75b   :  { %468 = vrot.lane.b32.xlu0 %v1265_v1, %s1315_s8 }
 0x7cd   :  { %v469_v3 = vpop.permute.xlu0 %468 }
 0x7ce   :  { %v471_v5 = vmul.f32 %v1263_v59, %v469_v3 }
 0x7d0   :  { %473 = vrot.lane.b32.xlu1 %v471_v5, %s1316_s9 }
 0x842   :  { %v474_v6 = vpop.permute.xlu1 %473 }
 0x843   :  { %1171 = vmatmul.mubr.msk.f32.vlgmr.msra.gmra.mrb[6].mxu1 %vm173_vm2, %v474_v6 }
 0x844   :  { %1225 = vmatpush3.bf16.msra.mxu1 %v1371_v7  ;;  %1184 = vmatprep.mubr.msk.f32.mxu1 %vm1311_vm1, %v1312_v4 }
 0x845   :  { %1229 = vmatprep.subr.bf16.mxu1 %v1310_v2 }
 0x916   :  { %v543_v10 = vpop.f32.mrb[6].mxu1 }
 0x917   :  { %v547_v11 = vadd.f32 %v543_v10, %v148_v9  ;;  %v1172_v12 = vpop.f32.mrb[7].mxu1  ;;  %v163_v9 = vadd.f32 %v1387_v8, %v1452_v33 }
 0x919   :  { %1266 = vtanh.f32 %v547_v11  ;;  %v1083_v14 = vmul.f32 -1.442695, %v547_v11 }
 0x91b   :  { %1268 = vpow2.f32 %v1083_v14 }
 0x923   :  { %v1267_v13 = vpop.eup %1266 }
 0x924   :  { %557 = vrot.lane.b32.xlu0 %v1267_v13, %s1313_s7 }
 0x925   :  { %v1269_v15 = vpop.eup %1268 }
 0x926   :  { %v551_v16 = vadd.f32 1.0, %v1269_v15 }
 0x928   :  { %1270 = vrcp.f32 %v551_v16 }
 0x932   :  { %v1271_v17 = vpop.eup %1270 }
 0x933   :  { %v555_v20 = vmul.f32 %v1271_v17, %v465_v0 }
 0x996   :  { %v558_v18 = vpop.permute.xlu0 %557 }
 0x997   :  { %v560_v19 = vmul.f32 %v1271_v17, %v558_v18 }
 0x999   :  { %562 = vrot.lane.b32.xlu1 %v560_v19, %s1314_s2 }
 0xa0b   :  { %v563_v21 = vpop.permute.xlu1 %562 }
 0xa0c   :  { %v565_v22 = vadd.f32 %v563_v21, %v555_v20 }
 0xa0e   :  { %1272 = vtanh.f32 %v565_v22 }
 0xa18   :  { %v1273_v27 = vpop.eup %1272 }
 0xa19   :  { %568 = vrot.lane.b32.xlu0 %v1273_v27, %s1315_s8 }
 0xa8b   :  { %v569_v28 = vpop.permute.xlu0 %568 }
 0xa8c   :  { %v571_v29 = vmul.f32 %v1271_v17, %v569_v28 }
 0xa8e   :  { %573 = vrot.lane.b32.xlu1 %v571_v29, %s1316_s9 }
 0xb00   :  { %v574_v34 = vpop.permute.xlu1 %573 }
 0xb01   :  { %1178 = vmatmul.mubr.msk.f32.vlgmr.msra.gmra.mrb[8].mxu0 %vm173_vm2, %v574_v34 }
 0xb02   :  { %1228 = vmatpush3.bf16.msra.mxu0 %v1371_v7  ;;  %1191 = vmatprep.mubr.msk.f32.mxu0 %vm1311_vm1, %v1312_v4 }
 0xb03   :  { %1232 = vmatprep.subr.bf16.mxu0 %v1310_v2 }
 0xbd4   :  { %v643_v36 = vpop.f32.mrb[8].mxu0 }
 0xbd5   :  { %v647_v37 = vadd.f32 %v643_v36, %v153_v35  ;;  %v1179_v38 = vpop.f32.mrb[9].mxu0 }
 0xbd7   :  { %1274 = vtanh.f32 %v647_v37  ;;  %v1085_v40 = vmul.f32 -1.442695, %v647_v37 }
 0xbd9   :  { %1276 = vpow2.f32 %v1085_v40  ;;  %v973_v40 = vld [vmem:[%s1506_s4 + $0x8] sm:$0xff] }
 0xbe1   :  { %v1275_v39 = vpop.eup %1274 }
 0xbe2   :  { %657 = vrot.lane.b32.xlu0 %v1275_v39, %s1313_s7 }
 0xbe3   :  { %v1277_v41 = vpop.eup %1276 }
 0xbe4   :  { %v651_v42 = vadd.f32 1.0, %v1277_v41  ;;  %v1233_v41 = vpack.c.bf16 %v973_v40, %v972_v32 }
 0xbe6   :  { %1278 = vrcp.f32 %v651_v42 }
 0xbf0   :  { %v1279_v43 = vpop.eup %1278 }
 0xbf1   :  { %v655_v2 = vmul.f32 %v1279_v43, %v565_v22 }
 0xc54   :  { %v658_v44 = vpop.permute.xlu0 %657 }
 0xc55   :  { %v660_v45 = vmul.f32 %v1279_v43, %v658_v44 }
 0xc57   :  { %662 = vrot.lane.b32.xlu1 %v660_v45, %s1314_s2 }
 0xcc9   :  { %v663_v46 = vpop.permute.xlu1 %662 }
 0xcca   :  { %v665_v47 = vadd.f32 %v663_v46, %v655_v2 }
 0xccc   :  { %1280 = vtanh.f32 %v665_v47 }
 0xcd6   :  { %v1281_v48 = vpop.eup %1280 }
 0xcd7   :  { %668 = vrot.lane.b32.xlu0 %v1281_v48, %s1315_s8 }
 0xd49   :  { %v669_v49 = vpop.permute.xlu0 %668 }
 0xd4a   :  { %v671_v50 = vmul.f32 %v1279_v43, %v669_v49  ;;  %v11_v43 = vstv %s1507_s5 }
 0xd4b   :  { %12 = vst [vmem:[#allocation2] sm:$0x1] %v11_v43 }
 0xd4c   :  { %673 = vrot.lane.b32.xlu1 %v671_v50, %s1316_s9 }
 0xd52   :  { %v1092_v46 = vld [vmem:[#allocation2] ss:$0 sm:$0xff] }
 0xdbe   :  { %v674_v51 = vpop.permute.xlu1 %673 }
 0xdbf   :  { %1185 = vmatmul.mubr.msk.f32.vlgmr.msra.gmra.mrb[8].mxu1 %vm173_vm2, %v674_v51 }
 0xdc0   :  { %1231 = vmatpush3.bf16.msra.mxu1 %v1371_v7  ;;  %1198 = vmatprep.mubr.msk.f32.mxu1 %vm1311_vm1, %v1312_v4 }
 0xe92   :  { %v743_v53 = vpop.f32.mrb[8].mxu1 }
 0xe93   :  { %v747_v54 = vadd.f32 %v743_v53, %v158_v52  ;;  %v1186_v55 = vpop.f32.mrb[9].mxu1 }
 0xe95   :  { %1282 = vtanh.f32 %v747_v54  ;;  %v1087_v57 = vmul.f32 -1.442695, %v747_v54 }
 0xe97   :  { %1284 = vpow2.f32 %v1087_v57 }
 0xe9f   :  { %v1283_v56 = vpop.eup %1282 }
 0xea0   :  { %757 = vrot.lane.b32.xlu0 %v1283_v56, %s1313_s7 }
 0xea1   :  { %v1285_v58 = vpop.eup %1284 }
 0xea2   :  { %v751_v59 = vadd.f32 1.0, %v1285_v58 }
 0xea4   :  { %1286 = vrcp.f32 %v751_v59 }
 0xeae   :  { %v1287_v60 = vpop.eup %1286 }
 0xeaf   :  { %v755_v62 = vmul.f32 %v1287_v60, %v665_v47 }
 0xf12   :  { %v758_v61 = vpop.permute.xlu0 %757 }
 0xf13   :  { %v760_v7 = vmul.f32 %v1287_v60, %v758_v61 }
 0xf15   :  { %762 = vrot.lane.b32.xlu1 %v760_v7, %s1314_s2 }
 0xf87   :  { %v763_v63 = vpop.permute.xlu1 %762 }
 0xf88   :  { %v765_v0 = vadd.f32 %v763_v63, %v755_v62 }
 0xf8a   :  { %1288 = vtanh.f32 %v765_v0 }
 0xf94   :  { %v1289_v1 = vpop.eup %1288 }
 0xf95   :  { %768 = vrot.lane.b32.xlu0 %v1289_v1, %s1315_s8 }
0x1007   :  { %v769_v3 = vpop.permute.xlu0 %768 }
0x1008   :  { %v771_v5 = vmul.f32 %v1287_v60, %v769_v3 }
0x100a   :  { %773 = vrot.lane.b32.xlu1 %v771_v5, %s1316_s9 }
0x107c   :  { %v774_v6 = vpop.permute.xlu1 %773 }
0x107d   :  { %1192 = vmatmul.mubr.msk.f32.vlgmr.msra.gmra.mrb[10].mxu0 %vm173_vm2, %v774_v6 }
0x107e   :  { %1205 = vmatprep.mubr.msk.f32.mxu0 %vm1311_vm1, %v1312_v4  ;;  %1234 = vmatpush3.bf16.msra.mxu0 %v1233_v41 }
0x1150   :  { %v843_v10 = vpop.f32.mrb[10].mxu0 }
0x1151   :  { %v847_v11 = vadd.f32 %v843_v10, %v163_v9  ;;  %v1193_v12 = vpop.f32.mrb[11].mxu0 }
0x1153   :  { %1290 = vtanh.f32 %v847_v11  ;;  %v1089_v14 = vmul.f32 -1.442695, %v847_v11 }
0x1155   :  { %1292 = vpow2.f32 %v1089_v14 }
0x115d   :  { %v1291_v13 = vpop.eup %1290 }
0x115e   :  { %857 = vrot.lane.b32.xlu0 %v1291_v13, %s1313_s7 }
0x115f   :  { %v1293_v15 = vpop.eup %1292 }
0x1160   :  { %v851_v16 = vadd.f32 1.0, %v1293_v15 }
0x1162   :  { %1294 = vrcp.f32 %v851_v16 }
0x116c   :  { %v1295_v17 = vpop.eup %1294 }
0x116d   :  { %v855_v4 = vmul.f32 %v1295_v17, %v765_v0 }
0x11d0   :  { %v858_v18 = vpop.permute.xlu0 %857 }
0x11d1   :  { %v860_v19 = vmul.f32 %v1295_v17, %v858_v18 }
0x11d3   :  { %862 = vrot.lane.b32.xlu1 %v860_v19, %s1314_s2 }
0x1245   :  { %v863_v20 = vpop.permute.xlu1 %862 }
0x1246   :  { %v865_v21 = vadd.f32 %v863_v20, %v855_v4 }
0x1248   :  { %1296 = vtanh.f32 %v865_v21 }
0x1252   :  { %v1297_v22 = vpop.eup %1296 }
0x1253   :  { %868 = vrot.lane.b32.xlu0 %v1297_v22, %s1315_s8 }
0x12c5   :  { %v869_v23 = vpop.permute.xlu0 %868 }
0x12c6   :  { %v871_v24 = vmul.f32 %v1295_v17, %v869_v23 }
0x12c8   :  { %873 = vrot.lane.b32.xlu1 %v871_v24, %s1316_s9 }
0x133a   :  { %v874_v25 = vpop.permute.xlu1 %873 }
0x133b   :  { %1199 = vmatmul.mubr.msk.f32.vlgmr.msra.gmra.mrb[10].mxu1 %vm173_vm2, %v874_v25 }
0x140e   :  { %v943_v27 = vpop.f32.mrb[10].mxu1 }
0x140f   :  { %v947_v28 = vadd.f32 %v943_v27, %v168_v26  ;;  %v1200_v29 = vpop.f32.mrb[11].mxu1 }
0x1411   :  { %1298 = vtanh.f32 %v947_v28  ;;  %v1091_v31 = vmul.f32 -1.442695, %v947_v28 }
0x1413   :  { %1300 = vpow2.f32 %v1091_v31 }
0x141b   :  { %v1299_v30 = vpop.eup %1298 }
0x141c   :  { %957 = vrot.lane.b32.xlu0 %v1299_v30, %s1313_s7 }
0x141d   :  { %v1301_v33 = vpop.eup %1300 }
0x141e   :  { %v951_v34 = vadd.f32 1.0, %v1301_v33 }
0x1420   :  { %1302 = vrcp.f32 %v951_v34 }
0x142a   :  { %v1303_v35 = vpop.eup %1302 }
0x142b   :  { %v955_v38 = vmul.f32 %v1303_v35, %v865_v21 }
0x148e   :  { %v958_v36 = vpop.permute.xlu0 %957 }
0x148f   :  { %v960_v37 = vmul.f32 %v1303_v35, %v958_v36 }
0x1491   :  { %962 = vrot.lane.b32.xlu1 %v960_v37, %s1314_s2 }
0x1503   :  { %v963_v39 = vpop.permute.xlu1 %962 }
0x1504   :  { %v965_v8 = vadd.f32 %v963_v39, %v955_v38 }
0x1506   :  { %1304 = vtanh.f32 %v965_v8 }
0x1510   :  { %v1305_v42 = vpop.eup %1304 }
0x1511   :  { %968 = vrot.lane.b32.xlu0 %v1305_v42, %s1315_s8 }
0x1583   :  { %v969_v44 = vpop.permute.xlu0 %968 }
0x1584   :  { %v971_v45 = vmul.f32 %v1303_v35, %v969_v44 }
0x1586   :  { %982 = vrot.lane.b32.xlu1 %v971_v45, %s1316_s9 }
0x15f8   :  { %v983_v2 = vpop.permute.xlu1 %982 }
0x15f9   :  { %1206 = vmatmul.mubr.msk.f32.vlgmr.msra.gmra.mrb[12].mxu0 %vm173_vm2, %v983_v2 }
0x16cc   :  { %v1052_v47 = vpop.f32.mrb[12].mxu0 }
0x16cd   :  { %v1053_v48 = vadd.f32 %v1092_v46, %v1052_v47  ;;  %v1207_v49 = vpop.f32.mrb[13].mxu0 }
0x16cf   :  { %v1094_v50 = vmul.f32 -1.442695, %v1053_v48 }
0x16d1   :  { %1306 = vpow2.f32 %v1094_v50 }
0x16db   :  { %v1307_v51 = vpop.eup %1306 }
0x16dc   :  { %v1059_v52 = vadd.f32 1.0, %v1307_v51 }
0x16de   :  { %1308 = vrcp.f32 %v1059_v52 }
0x16e8   :  { %v1309_v53 = vpop.eup %1308 }
0x16e9   :  { %1063 = vst.msk [vmem:[%s1508_s6] sm:$0xff] %vm1062_vm3, %v1309_v53 }

</bundles_post_ra>
